<compile_context>
chip_gen: v7x
topology: tpu7x:2x2x1
jax: 0.10.0
libtpu: 0.0.40
codegen_flags: <defaults>
</compile_context>

<pallas_src>
import jax
import jax.numpy as jnp
from jax.experimental import pallas as pl
from jax.experimental.pallas import tpu as pltpu

EPS = 1e-5
LANE = 128      # vreg lane width (last dim)
SUBLANE = 8     # f32 sublane height (second-to-last dim)


def _round_up(n, m):
    return ((n + m - 1) // m) * m


def _tpu_vmem_config():
    """Per-generation VMEM budget + megacore preference."""
    try:
        kind = jax.devices()[0].device_kind.lower()
    except Exception:
        kind = ""
    if "v7" in kind:
        # 64 MiB physical per TensorCore; keep >=2 feature tiles so the
        # "parallel" grid axis shards across both TCs.
        return {"vmem_limit": 48 << 20, "min_feat_tiles": 2}
    if "v5" in kind or "v6" in kind:
        # 128 MiB physical; raise the scoped default (16/32 MiB) explicitly.
        return {"vmem_limit": 96 << 20, "min_feat_tiles": 1}
    # Unknown generation: conservative budget that fits every current TPU.
    return {"vmem_limit": 48 << 20, "min_feat_tiles": 1}


def _working_set_bytes(feat_tile, b_pad, k):
    f32 = 4
    w_tile = 2 * feat_tile * k * f32          # W feature tile, double-buffered
    x_res = b_pad * k * f32                   # x resident, single-buffered
    out_tile = 2 * b_pad * feat_tile * f32    # output tile, double-buffered
    tmp = 2 * b_pad * feat_tile * f32         # in-kernel f32 h + centered temp
    misc = 8 * feat_tile * f32                # gamma/beta + scale/shift rows
    return w_tile + x_res + out_tile + tmp + misc


def _pick_feat_tile(n_pad, b_pad, k, budget_bytes, min_tiles):
    """Fewest grid steps: largest 128-multiple tile whose working set fits VMEM."""
    max_tiles = n_pad // LANE
    for g in range(min(min_tiles, max_tiles), max_tiles + 1):
        if n_pad % g:
            continue
        ft = n_pad // g
        if ft % LANE:
            continue
        if _working_set_bytes(ft, b_pad, k) <= budget_bytes:
            return ft
    # Fall back to the smallest legal tile (large-batch accumulator path is a TODO).
    return LANE


def _make_kernel(inv_b, mask_rows, true_b):
    def kernel(x_ref, w_ref, gamma_ref, beta_ref, o_ref):
        # x.float() from the PyTorch module (no-op when x is already f32).
        # (bf16 x/W with f32 MXU accumulation would halve HBM/VMEM traffic on
        #  v6e/v7x if the caller accepts bf16 Linear rounding; kept f32 here.)
        x = x_ref[...].astype(jnp.float32)       # (B_pad, K)
        w = w_ref[...].astype(jnp.float32)       # (Nt, K) feature tile of W

        # Linear on the MXU: h = x @ W.T (transposed RHS consumed natively).
        h = jax.lax.dot_general(
            x, w,
            dimension_numbers=(((1,), (1,)), ((), ())),
            preferred_element_type=jnp.float32,
        )                                        # (B_pad, Nt)

        # BatchNorm1d training-mode stats, two passes inside the tile
        # (avoids E[h^2]-mean^2 cancellation).  Padded batch rows are zero in
        # h so they drop out of the mean sum; they are masked from the
        # variance pass, and both sums divide by the true batch size.
        mean = jnp.sum(h, axis=0, keepdims=True) * inv_b          # (1, Nt)
        c = h - mean
        if mask_rows:
            rows = jax.lax.broadcasted_iota(jnp.int32, (h.shape[0], 1), 0)
            c = jnp.where(rows < true_b, c, 0.0)
        var = jnp.sum(c * c, axis=0, keepdims=True) * inv_b       # biased var
        inv_std = jax.lax.rsqrt(var + EPS)                        # EUP slot

        # Fused affine epilogue: y = h * scale + shift.
        scale = inv_std * gamma_ref[...]
        shift = beta_ref[...] - mean * scale
        o_ref[...] = h * scale + shift
    return kernel


def _build_call(kernel, b_pad, k, n_pad, feat_tile, vmem_limit, single_buffer_x):
    x_kw = {"pipeline_mode": pl.Buffered(1)} if single_buffer_x else {}
    return pl.pallas_call(
        kernel,
        out_shape=jax.ShapeDtypeStruct((b_pad, n_pad), jnp.float32),
        grid=(n_pad // feat_tile,),
        in_specs=[
            # x: full batch, block index constant across the grid.
            pl.BlockSpec((b_pad, k), lambda j: (0, 0), **x_kw),
            pl.BlockSpec((feat_tile, k), lambda j: (j, 0)),      # W feature slice
            pl.BlockSpec((1, feat_tile), lambda j: (0, j)),      # gamma slice
            pl.BlockSpec((1, feat_tile), lambda j: (0, j)),      # beta slice
        ],
        out_specs=pl.BlockSpec((b_pad, feat_tile), lambda j: (0, j)),  # lane-dense
        compiler_params=pltpu.CompilerParams(
            dimension_semantics=("parallel",),
            vmem_limit_bytes=int(vmem_limit),
        ),
    )


def prepare_params(w, b, gamma, beta):
    """Pad parameters to a lane multiple ONCE (model construction), not per call.

    The Linear bias `b` is accepted for API parity but dropped: a per-feature
    constant is exactly cancelled by the BatchNorm mean subtraction.
    """
    del b
    n_units, _ = w.shape
    n_pad = _round_up(n_units, LANE)
    pad = n_pad - n_units
    w_p = jnp.pad(w, ((0, pad), (0, 0)))                 # zero rows -> padded h cols = 0
    g_p = jnp.pad(gamma, (0, pad)).reshape(1, n_pad)     # zero gamma -> padded cols output 0
    be_p = jnp.pad(beta, (0, pad)).reshape(1, n_pad)
    return {"w": w_p, "gamma": g_p, "beta": be_p, "n_units": n_units}


_SINGLE_BUFFER_X = True  # flipped off if the installed jax rejects pl.Buffered(1)


def mlp_dqn_forward(x, params, trim=True):
    """Fused Linear + BatchNorm1d(training) forward.

    x: (B, input_dim).  trim=True returns the exact module output (B, n_units);
    trim=False returns the lane/sublane-padded (B_pad, n_pad) slab so hot-path
    consumers skip the trailing slice copy (recommended when n_units is chosen
    as a multiple of 128 and B as a multiple of 8, where trim is a no-op anyway).
    """
    global _SINGLE_BUFFER_X
    w_p, g_p, be_p = params["w"], params["gamma"], params["beta"]
    n_pad, k = w_p.shape
    B = x.shape[0]

    # Sublane-pad the batch so the (B, feat_tile) stores and axis-0 reductions
    # run on full vregs.  Zero rows do not perturb the batch statistics.
    b_pad = _round_up(max(B, 1), SUBLANE)
    if b_pad != B:
        x = jnp.pad(x, ((0, b_pad - B), (0, 0)))

    cfg = _tpu_vmem_config()
    budget = cfg["vmem_limit"] - (8 << 20)   # headroom below the scoped limit
    feat_tile = _pick_feat_tile(n_pad, b_pad, k, budget, cfg["min_feat_tiles"])

    kernel = _make_kernel(1.0 / B, b_pad != B, B)

    if _SINGLE_BUFFER_X:
        try:
            out = _build_call(kernel, b_pad, k, n_pad, feat_tile,
                              cfg["vmem_limit"], True)(x, w_p, g_p, be_p)
        except Exception:
            _SINGLE_BUFFER_X = False
            out = _build_call(kernel, b_pad, k, n_pad, feat_tile,
                              cfg["vmem_limit"], False)(x, w_p, g_p, be_p)
    else:
        out = _build_call(kernel, b_pad, k, n_pad, feat_tile,
                          cfg["vmem_limit"], False)(x, w_p, g_p, be_p)

    if trim:
        n_units = params["n_units"]
        if b_pad != B or n_pad != n_units:
            out = out[:B, :n_units]
    return out


if __name__ == "__main__":
    # Small shapes consistent with MLP_DQN(input_dim=16, output_dim=unused, n_units=32)
    B, input_dim, n_units = 8, 16, 32

    key = jax.random.PRNGKey(0)
    kx, kw, kb = jax.random.split(key, 3)

    # Deterministic synthetic parameters (PyTorch-style uniform fan-in init).
    bound = 1.0 / (input_dim ** 0.5)
    w = jax.random.uniform(kw, (n_units, input_dim), jnp.float32, -bound, bound)
    b = jax.random.uniform(kb, (n_units,), jnp.float32, -bound, bound)
    gamma = jnp.ones((n_units,), jnp.float32)   # BatchNorm1d weight init
    beta = jnp.zeros((n_units,), jnp.float32)   # BatchNorm1d bias init

    x = jax.random.normal(kx, (B, input_dim), jnp.float32)

    params = prepare_params(w, b, gamma, beta)   # pad once at "model construction"
    out = mlp_dqn_forward(x, params)             # (B, n_units)
    jax.block_until_ready(out)

    # Pure-JAX reference of the full module semantics (including the Linear
    # bias, which the BN mean subtraction cancels -> results must still match).
    h_ref = x @ w.T + b
    mean_ref = h_ref.mean(axis=0, keepdims=True)
    var_ref = ((h_ref - mean_ref) ** 2).mean(axis=0, keepdims=True)
    y_ref = (h_ref - mean_ref) / jnp.sqrt(var_ref + EPS) * gamma + beta
    assert out.shape == (B, n_units)
    assert jnp.allclose(out, y_ref, atol=1e-4, rtol=1e-4)

    print("KERNEL_OK")
</pallas_src>

<mosaic_0001>
module attributes {stable_mosaic.version = 11 : i64} {
  func.func @kernel(%arg0: i32, %arg1: memref<8x16xf32, #tpu.memory_space<vmem>>, %arg2: memref<128x16xf32, #tpu.memory_space<vmem>>, %arg3: memref<1x128xf32, #tpu.memory_space<vmem>>, %arg4: memref<1x128xf32, #tpu.memory_space<vmem>>, %arg5: memref<8x128xf32, #tpu.memory_space<vmem>>) attributes {dimension_semantics = [#tpu.dimension_semantics<parallel>], iteration_bounds = array<i64: 1>, scalar_prefetch = 0 : i64, scratch_operands = 0 : i64, tpu.core_type = #tpu.core_type<tc>, window_params = [{pipeline_mode = #tpu.pipeline_mode<synchronous>, transform_indices = @transform_0, window_bounds = array<i64: 8, 16>}, {transform_indices = @transform_1, window_bounds = array<i64: 128, 16>}, {transform_indices = @transform_2, window_bounds = array<i64: 1, 128>}, {transform_indices = @transform_3, window_bounds = array<i64: 1, 128>}, {transform_indices = @transform_4, window_bounds = array<i64: 8, 128>}]} {
    %c0 = arith.constant 0 : index
    %c0_0 = arith.constant 0 : index
    %0 = vector.load %arg1[%c0, %c0_0] : memref<8x16xf32, #tpu.memory_space<vmem>>, vector<8x16xf32>
    %c0_1 = arith.constant 0 : index
    %c0_2 = arith.constant 0 : index
    %1 = vector.load %arg2[%c0_1, %c0_2] : memref<128x16xf32, #tpu.memory_space<vmem>>, vector<128x16xf32>
    %cst = arith.constant dense<0.000000e+00> : vector<8x128xf32>
    %2 = tpu.matmul %0, %1, %cst {dimension_numbers = #tpu.dot_dimension_numbers<[1], [1], [0], [0], [0, 0, 1, 0], [], []>} : vector<8x16xf32>, vector<128x16xf32>, vector<8x128xf32> -> vector<8x128xf32>
    %cst_3 = arith.constant dense<0.000000e+00> : vector<128xf32>
    %3 = vector.multi_reduction <add>, %2, %cst_3 [0] : vector<8x128xf32> to vector<128xf32>
    %4 = vector.shape_cast %3 : vector<128xf32> to vector<1x128xf32>
    %cst_4 = arith.constant 1.250000e-01 : f32
    %5 = vector.broadcast %cst_4 : f32 to vector<1x128xf32>
    %6 = arith.mulf %4, %5 : vector<1x128xf32>
    %7 = vector.broadcast %6 : vector<1x128xf32> to vector<8x128xf32>
    %8 = arith.subf %2, %7 : vector<8x128xf32>
    %9 = arith.mulf %8, %8 : vector<8x128xf32>
    %cst_5 = arith.constant dense<0.000000e+00> : vector<128xf32>
    %10 = vector.multi_reduction <add>, %9, %cst_5 [0] : vector<8x128xf32> to vector<128xf32>
    %11 = vector.shape_cast %10 : vector<128xf32> to vector<1x128xf32>
    %cst_6 = arith.constant 1.250000e-01 : f32
    %12 = vector.broadcast %cst_6 : f32 to vector<1x128xf32>
    %13 = arith.mulf %11, %12 : vector<1x128xf32>
    %cst_7 = arith.constant 9.99999974E-6 : f32
    %14 = vector.broadcast %cst_7 : f32 to vector<1x128xf32>
    %15 = arith.addf %13, %14 : vector<1x128xf32>
    %16 = math.rsqrt %15 : vector<1x128xf32>
    %c0_8 = arith.constant 0 : index
    %c0_9 = arith.constant 0 : index
    %17 = vector.load %arg3[%c0_8, %c0_9] : memref<1x128xf32, #tpu.memory_space<vmem>>, vector<1x128xf32>
    %18 = arith.mulf %16, %17 : vector<1x128xf32>
    %c0_10 = arith.constant 0 : index
    %c0_11 = arith.constant 0 : index
    %19 = vector.load %arg4[%c0_10, %c0_11] : memref<1x128xf32, #tpu.memory_space<vmem>>, vector<1x128xf32>
    %20 = arith.mulf %6, %18 : vector<1x128xf32>
    %21 = arith.subf %19, %20 : vector<1x128xf32>
    %22 = vector.broadcast %18 : vector<1x128xf32> to vector<8x128xf32>
    %23 = arith.mulf %2, %22 : vector<8x128xf32>
    %24 = vector.broadcast %21 : vector<1x128xf32> to vector<8x128xf32>
    %25 = arith.addf %23, %24 : vector<8x128xf32>
    %c0_12 = arith.constant 0 : index
    %c0_13 = arith.constant 0 : index
    %26 = vector.load %arg5[%c0_12, %c0_13] : memref<8x128xf32, #tpu.memory_space<vmem>>, vector<8x128xf32>
    tpu.vector_store %arg5[%c0_12, %c0_13], %25 {strides = array<i32>} : memref<8x128xf32, #tpu.memory_space<vmem>>, vector<8x128xf32>,
    return
  }
  func.func @transform_0(%arg0: i32) -> (i32, i32) {
    %c0_i32 = arith.constant 0 : i32
    %c0_i32_0 = arith.constant 0 : i32
    %c0_i32_1 = arith.constant 0 : i32
    return %c0_i32, %c0_i32_0 : i32, i32
  }
  func.func @transform_1(%arg0: i32) -> (i32, i32) {
    %c0_i32 = arith.constant 0 : i32
    %c0_i32_0 = arith.constant 0 : i32
    return %arg0, %c0_i32 : i32, i32
  }
  func.func @transform_2(%arg0: i32) -> (i32, i32) {
    %c0_i32 = arith.constant 0 : i32
    %c0_i32_0 = arith.constant 0 : i32
    return %c0_i32, %arg0 : i32, i32
  }
  func.func @transform_3(%arg0: i32) -> (i32, i32) {
    %c0_i32 = arith.constant 0 : i32
    %c0_i32_0 = arith.constant 0 : i32
    return %c0_i32, %arg0 : i32, i32
  }
  func.func @transform_4(%arg0: i32) -> (i32, i32) {
    %c0_i32 = arith.constant 0 : i32
    %c0_i32_0 = arith.constant 0 : i32
    return %c0_i32, %arg0 : i32, i32
  }
}

module attributes {stable_mosaic.version = 11 : i64} {
  func.func @kernel(%arg0: i32, %arg1: memref<8x16xf32, #tpu.memory_space<vmem>>, %arg2: memref<128x16xf32, #tpu.memory_space<vmem>>, %arg3: memref<1x128xf32, #tpu.memory_space<vmem>>, %arg4: memref<1x128xf32, #tpu.memory_space<vmem>>, %arg5: memref<8x128xf32, #tpu.memory_space<vmem>>) attributes {dimension_semantics = [#tpu.dimension_semantics<parallel>], iteration_bounds = array<i64: 1>, scalar_prefetch = 0 : i64, scratch_operands = 0 : i64, tpu.core_type = #tpu.core_type<tc>, window_params = [{pipeline_mode = #tpu.pipeline_mode<synchronous>, transform_indices = @transform_0, window_bounds = array<i64: 8, 16>}, {transform_indices = @transform_1, window_bounds = array<i64: 128, 16>}, {transform_indices = @transform_2, window_bounds = array<i64: 1, 128>}, {transform_indices = @transform_3, window_bounds = array<i64: 1, 128>}, {transform_indices = @transform_4, window_bounds = array<i64: 8, 128>}]} {
    %c0 = arith.constant 0 : index
    %c0_0 = arith.constant 0 : index
    %0 = vector.load %arg1[%c0, %c0_0] : memref<8x16xf32, #tpu.memory_space<vmem>>, vector<8x16xf32>
    %c0_1 = arith.constant 0 : index
    %c0_2 = arith.constant 0 : index
    %1 = vector.load %arg2[%c0_1, %c0_2] : memref<128x16xf32, #tpu.memory_space<vmem>>, vector<128x16xf32>
    %cst = arith.constant dense<0.000000e+00> : vector<8x128xf32>
    %2 = tpu.matmul %0, %1, %cst {dimension_numbers = #tpu.dot_dimension_numbers<[1], [1], [0], [0], [0, 0, 1, 0], [], []>} : vector<8x16xf32>, vector<128x16xf32>, vector<8x128xf32> -> vector<8x128xf32>
    %cst_3 = arith.constant dense<0.000000e+00> : vector<128xf32>
    %3 = vector.multi_reduction <add>, %2, %cst_3 [0] : vector<8x128xf32> to vector<128xf32>
    %4 = vector.shape_cast %3 : vector<128xf32> to vector<1x128xf32>
    %cst_4 = arith.constant 1.250000e-01 : f32
    %5 = vector.broadcast %cst_4 : f32 to vector<1x128xf32>
    %6 = arith.mulf %4, %5 : vector<1x128xf32>
    %7 = vector.broadcast %6 : vector<1x128xf32> to vector<8x128xf32>
    %8 = arith.subf %2, %7 : vector<8x128xf32>
    %9 = arith.mulf %8, %8 : vector<8x128xf32>
    %cst_5 = arith.constant dense<0.000000e+00> : vector<128xf32>
    %10 = vector.multi_reduction <add>, %9, %cst_5 [0] : vector<8x128xf32> to vector<128xf32>
    %11 = vector.shape_cast %10 : vector<128xf32> to vector<1x128xf32>
    %cst_6 = arith.constant 1.250000e-01 : f32
    %12 = vector.broadcast %cst_6 : f32 to vector<1x128xf32>
    %13 = arith.mulf %11, %12 : vector<1x128xf32>
    %cst_7 = arith.constant 9.99999974E-6 : f32
    %14 = vector.broadcast %cst_7 : f32 to vector<1x128xf32>
    %15 = arith.addf %13, %14 : vector<1x128xf32>
    %16 = math.rsqrt %15 : vector<1x128xf32>
    %c0_8 = arith.constant 0 : index
    %c0_9 = arith.constant 0 : index
    %17 = vector.load %arg3[%c0_8, %c0_9] : memref<1x128xf32, #tpu.memory_space<vmem>>, vector<1x128xf32>
    %18 = arith.mulf %16, %17 : vector<1x128xf32>
    %c0_10 = arith.constant 0 : index
    %c0_11 = arith.constant 0 : index
    %19 = vector.load %arg4[%c0_10, %c0_11] : memref<1x128xf32, #tpu.memory_space<vmem>>, vector<1x128xf32>
    %20 = arith.mulf %6, %18 : vector<1x128xf32>
    %21 = arith.subf %19, %20 : vector<1x128xf32>
    %22 = vector.broadcast %18 : vector<1x128xf32> to vector<8x128xf32>
    %23 = arith.mulf %2, %22 : vector<8x128xf32>
    %24 = vector.broadcast %21 : vector<1x128xf32> to vector<8x128xf32>
    %25 = arith.addf %23, %24 : vector<8x128xf32>
    %c0_12 = arith.constant 0 : index
    %c0_13 = arith.constant 0 : index
    %26 = vector.load %arg5[%c0_12, %c0_13] : memref<8x128xf32, #tpu.memory_space<vmem>>, vector<8x128xf32>
    tpu.vector_store %arg5[%c0_12, %c0_13], %25 {strides = array<i32>} : memref<8x128xf32, #tpu.memory_space<vmem>>, vector<8x128xf32>,
    return
  }
  func.func @transform_0(%arg0: i32) -> (i32, i32) {
    %c0_i32 = arith.constant 0 : i32
    %c0_i32_0 = arith.constant 0 : i32
    %c0_i32_1 = arith.constant 0 : i32
    return %c0_i32, %c0_i32_0 : i32, i32
  }
  func.func @transform_1(%arg0: i32) -> (i32, i32) {
    %c0_i32 = arith.constant 0 : i32
    %c0_i32_0 = arith.constant 0 : i32
    return %arg0, %c0_i32 : i32, i32
  }
  func.func @transform_2(%arg0: i32) -> (i32, i32) {
    %c0_i32 = arith.constant 0 : i32
    %c0_i32_0 = arith.constant 0 : i32
    return %c0_i32, %arg0 : i32, i32
  }
  func.func @transform_3(%arg0: i32) -> (i32, i32) {
    %c0_i32 = arith.constant 0 : i32
    %c0_i32_0 = arith.constant 0 : i32
    return %c0_i32, %arg0 : i32, i32
  }
  func.func @transform_4(%arg0: i32) -> (i32, i32) {
    %c0_i32 = arith.constant 0 : i32
    %c0_i32_0 = arith.constant 0 : i32
    return %c0_i32, %arg0 : i32, i32
  }
}

</mosaic_0001>

<bundles_post_ra>
// kernel: tpu_custom_call.1
= control target key start
LH: loop header
LB: loop body
LE: loop exit
PB: predicated region body
PF: predicated region fallthrough
CT: control target
= control target key end

     0   :  { %vm35_vm0 = vcmask 130048   ;;  %v338_v2 = vmov 0.0|0.0   ;;  %vm339_vm2 = vmmov 0   ;;  %v340_v5 = vmov 0.0   ;;  %s459_s0 = inlined_call_operand.vmem [shape: f32[8,16], index: 0, kind: input, shape index: {}]   ;;  %s460_s1 = inlined_call_operand.vmem [shape: f32[128,16], index: 1, kind: input, shape index: {}]   ;;  %s461_s2 = inlined_call_operand.vmem [shape: f32[1,128], index: 2, kind: input, shape index: {}]   ;;  %s462_s3 = inlined_call_operand.vmem [shape: f32[1,128], index: 3, kind: input, shape index: {}]   ;;  %s463_s4 = inlined_call_operand.hbm [shape: f32[8,128], index: 4, kind: output, shape index: {}]  }
   0x1   :  { %v19_v0 = vld [vmem:[%s460_s1] sm:$0xff]  ;;  %v20_v1 = vld [vmem:[%s460_s1 + $0x8] sm:$0xff]  ;;  %276 = vmatprep.subr.bf16.mxu0 %v338_v2  ;;  %vm375_vm1 = vmpackc.low %vm35_vm0, %vm35_vm0  ;;  %273 = vmatprep.mubr.msk.f32.mxu0 %vm339_vm2, %v340_v5 }
   0x2   :  { %v277_v3 = vpack.c.bf16 %v20_v1, %v19_v0  ;;  %v21_v6 = vld [vmem:[%s460_s1 + $0x10] sm:$0xff]  ;;  %v22_v7 = vld [vmem:[%s460_s1 + $0x18] sm:$0xff] }
   0x4   :  { %279 = vmatpush3.bf16.xpose.msk.msra.mxu0 %vm375_vm1, %v277_v3 }
   0x5   :  { %280 = vmatprep.subr.bf16.mxu0 %v338_v2 }
   0x6   :  { %9 = vsyncpa [#allocation3], 0  ;;  %v281_v8 = vpack.c.bf16 %v22_v7, %v21_v6  ;;  %v23_v9 = vld [vmem:[%s460_s1 + $0x20] sm:$0xff]  ;;  %v24_v10 = vld [vmem:[%s460_s1 + $0x28] sm:$0xff]  ;;  %v180_v47 = vlaneseq  ;;  %s341_s25 = smov [#allocation2]  }
   0x7   :  { %v285_v11 = vpack.c.bf16 %v24_v10, %v23_v9  ;;  %v25_v12 = vld [vmem:[%s460_s1 + $0x30] sm:$0xff]  ;;  %v26_v13 = vld [vmem:[%s460_s1 + $0x38] sm:$0xff]  ;;  %v27_v15 = vld [vmem:[%s460_s1 + $0x40] sm:$0xff]  ;;  %s199_s26 = sshll.u32 %s341_s25, 4  ;;  %s200_s26 = int_to_ptr.vmem [resolvable:$true] %s199_s26 }
   0x8   :  { %v289_v14 = vpack.c.bf16 %v26_v13, %v25_v12  ;;  %v28_v16 = vld [vmem:[%s460_s1 + $0x48] sm:$0xff]  ;;  %v29_v18 = vld [vmem:[%s460_s1 + $0x50] sm:$0xff]  ;;  %v30_v19 = vld [vmem:[%s460_s1 + $0x58] sm:$0xff]  ;;  %v181_v48 = vshrl.u32 %v180_v47, 7  ;;  %s314_s27 = scalar_lea.vmem %s200_s26, 128  ;;  %p319_p1 = scmp.lt.s32.totalorder %s200_s26, %s200_s26 }
   0x9   :  { %v293_v17 = vpack.c.bf16 %v28_v16, %v27_v15  ;;  %v297_v20 = vpack.c.bf16 %v30_v19, %v29_v18  ;;  %v31_v21 = vld [vmem:[%s460_s1 + $0x60] sm:$0xff]  ;;  %v32_v22 = vld [vmem:[%s460_s1 + $0x68] sm:$0xff]  ;;  %v33_v24 = vld [vmem:[%s460_s1 + $0x70] sm:$0xff]  ;;  %p315_p0 = scmp.ne.s32.totalorder %s200_s26, %s314_s27  ;;  %p320_p2 = scmp.lt.s32.totalorder %s314_s27, %s314_s27 }
   0xa   :  { %v301_v23 = vpack.c.bf16 %v32_v22, %v31_v21  ;;  %v34_v25 = vld [vmem:[%s460_s1 + $0x78] sm:$0xff]  ;;  %v18_v27 = vld [vmem:[%s459_s0] sm:$0xff]  ;;  %v182_v50 = vsub.s32 0, %v181_v48 }
   0xb   :  { %v305_v26 = vpack.c.bf16 %v34_v25, %v33_v24  ;;  %v175_v49 = vld [vmem:[%s461_s2] sm:$0x1]  ;;  %p321_p3 = por %p320_p2, %p319_p1 }
   0xc   :  { %283 = vmatpush3.bf16.xpose.msk.msra.mxu0 %vm375_vm1, %v281_v8  ;;  %v177_v53 = vld [vmem:[%s462_s3] sm:$0x1] }
   0xd   :  { %284 = vmatprep.subr.bf16.mxu0 %v338_v2  ;;  %p322_p4 = pnand %p321_p3, %p315_p0 }
  0x14   :  { %287 = vmatpush3.bf16.xpose.msk.msra.mxu0 %vm375_vm1, %v285_v11 }
  0x15   :  { %288 = vmatprep.subr.bf16.mxu0 %v338_v2 }
  0x1c   :  { %291 = vmatpush3.bf16.xpose.msk.msra.mxu0 %vm375_vm1, %v289_v14 }
  0x1d   :  { %292 = vmatprep.subr.bf16.mxu0 %v338_v2 }
  0x24   :  { %295 = vmatpush3.bf16.xpose.msk.msra.mxu0 %vm375_vm1, %v293_v17 }
  0x25   :  { %296 = vmatprep.subr.bf16.mxu0 %v338_v2 }
  0x2c   :  { %299 = vmatpush3.bf16.xpose.msk.msra.mxu0 %vm375_vm1, %v297_v20 }
  0x2d   :  { %300 = vmatprep.subr.bf16.mxu0 %v338_v2 }
  0x34   :  { %303 = vmatpush3.bf16.xpose.msk.msra.mxu0 %vm375_vm1, %v301_v23 }
  0x35   :  { %304 = vmatprep.subr.bf16.mxu0 %v338_v2 }
  0x3c   :  { %307 = vmatpush3.bf16.xpose.msk.msra.mxu0 %vm375_vm1, %v305_v26 }
  0x43   :  { %274 = vmatmul.mubr.msk.f32.vlgmr.msra.gmra.mrb[0].mxu0 %vm35_vm0, %v18_v27 }
 0x116   :  { %v153_v28 = vpop.f32.mrb[0].mxu0 }
 0x117   :  { %v157_v29 = vrot.slane %v153_v28, 4  ;;  %v275_v30 = vpop.f32.mrb[1].mxu0 }
 0x119   :  { %v158_v31 = vadd.f32 %v157_v29, %v153_v28 }
 0x11b   :  { %v159_v32 = vrot.slane %v158_v31, 2 }
 0x11d   :  { %v160_v33 = vadd.f32 %v159_v32, %v158_v31 }
 0x11f   :  { %v161_v34 = vrot.slane %v160_v33, 1 }
 0x121   :  { %v162_v35 = vadd.f32 %v161_v34, %v160_v33 }
 0x123   :  { %v163_v36 = vmul.f32 0.125, %v162_v35 }
 0x125   :  { %v164_v37 = vsub.f32 %v153_v28, %v163_v36 }
 0x127   :  { %v165_v38 = vmul.f32 %v164_v37, %v164_v37 }
 0x129   :  { %v166_v39 = vrot.slane %v165_v38, 4 }
 0x12b   :  { %v167_v40 = vadd.f32 %v166_v39, %v165_v38 }
 0x12d   :  { %v168_v41 = vrot.slane %v167_v40, 2 }
 0x12f   :  { %v169_v42 = vadd.f32 %v168_v41, %v167_v40 }
 0x131   :  { %v170_v43 = vrot.slane %v169_v42, 1 }
 0x133   :  { %v171_v44 = vadd.f32 %v170_v43, %v169_v42 }
 0x135   :  { %v172_v45 = vmul.f32 0.125, %v171_v44 }
 0x137   :  { %v173_v46 = vadd.f32 1e-05, %v172_v45 }
 0x139   :  { %312 = vrsqrt.f32 %v173_v46 }
 0x143   :  { %v313_v51 = vpop.eup %312 }
 0x144   :  { %v176_v52 = vmul.f32 %v313_v51, %v175_v49 }
 0x146   :  { %v178_v54 = vmul.f32 %v176_v52, %v163_v36  ;;  %v183_v55 = vrot.slane %v176_v52, %v182_v50 }
 0x148   :  { %v179_v56 = vsub.f32 %v177_v53, %v178_v54  ;;  %v184_v57 = vmul.f32 %v183_v55, %v153_v28 }
 0x14a   :  { %v189_v58 = vrot.slane %v179_v56, %v182_v50 }
 0x14c   :  { %v191_v59 = vadd.f32 %v189_v58, %v184_v57 }
 0x14e   :  { %192 = vst [vmem:[#allocation2] sm:$0xff] %v191_v59 }
 0x14f   :  { %325 = shalt.err (!%p322_p4)
}
 0x150   :  { %s326_s3 = scalar_lea.hbm %s463_s4, 128 }
 0x151   :  { %p327_p5 = scmp.ne.s32.totalorder %s463_s4, %s326_s3  ;;  %p330_p6 = scmp.lt.u32.totalorder %s326_s3, %s463_s4 }
 0x153   :  { %p332_p7 = pnand %p330_p6, %p327_p5 }
 0x155   :  { %335 = shalt.err (!%p332_p7)
}
 0x156   :  { %202 = dma.vmem_to_hbm [thread:$0]  %s200_s26, 128, %s463_s4, [#allocation3]  }
 0x157   :  { %336 = dma.done.wait [#allocation3], 128  }
 0x158   :  { %337 = vsyncadd [#allocation3], 4294967168 }
 0x159   :  { %206 = vsyncpa [#allocation3], 1 }

// kernel: tpu_custom_call.1
= control target key start
LH: loop header
LB: loop body
LE: loop exit
PB: predicated region body
PF: predicated region fallthrough
CT: control target
= control target key end

     0   :  { %vm35_vm0 = vcmask 130048   ;;  %v338_v2 = vmov 0.0|0.0   ;;  %vm339_vm2 = vmmov 0   ;;  %v340_v5 = vmov 0.0   ;;  %s459_s0 = inlined_call_operand.vmem [shape: f32[8,16], index: 0, kind: input, shape index: {}]   ;;  %s460_s1 = inlined_call_operand.vmem [shape: f32[128,16], index: 1, kind: input, shape index: {}]   ;;  %s461_s2 = inlined_call_operand.vmem [shape: f32[1,128], index: 2, kind: input, shape index: {}]   ;;  %s462_s3 = inlined_call_operand.vmem [shape: f32[1,128], index: 3, kind: input, shape index: {}]   ;;  %s463_s4 = inlined_call_operand.hbm [shape: f32[8,128], index: 4, kind: output, shape index: {}]  }
   0x1   :  { %v19_v0 = vld [vmem:[%s460_s1] sm:$0xff]  ;;  %v20_v1 = vld [vmem:[%s460_s1 + $0x8] sm:$0xff]  ;;  %276 = vmatprep.subr.bf16.mxu0 %v338_v2  ;;  %vm375_vm1 = vmpackc.low %vm35_vm0, %vm35_vm0  ;;  %273 = vmatprep.mubr.msk.f32.mxu0 %vm339_vm2, %v340_v5 }
   0x2   :  { %v277_v3 = vpack.c.bf16 %v20_v1, %v19_v0  ;;  %v21_v6 = vld [vmem:[%s460_s1 + $0x10] sm:$0xff]  ;;  %v22_v7 = vld [vmem:[%s460_s1 + $0x18] sm:$0xff] }
   0x4   :  { %279 = vmatpush3.bf16.xpose.msk.msra.mxu0 %vm375_vm1, %v277_v3 }
   0x5   :  { %280 = vmatprep.subr.bf16.mxu0 %v338_v2 }
   0x6   :  { %9 = vsyncpa [#allocation3], 0  ;;  %v281_v8 = vpack.c.bf16 %v22_v7, %v21_v6  ;;  %v23_v9 = vld [vmem:[%s460_s1 + $0x20] sm:$0xff]  ;;  %v24_v10 = vld [vmem:[%s460_s1 + $0x28] sm:$0xff]  ;;  %v180_v47 = vlaneseq  ;;  %s341_s25 = smov [#allocation2]  }
   0x7   :  { %v285_v11 = vpack.c.bf16 %v24_v10, %v23_v9  ;;  %v25_v12 = vld [vmem:[%s460_s1 + $0x30] sm:$0xff]  ;;  %v26_v13 = vld [vmem:[%s460_s1 + $0x38] sm:$0xff]  ;;  %v27_v15 = vld [vmem:[%s460_s1 + $0x40] sm:$0xff]  ;;  %s199_s26 = sshll.u32 %s341_s25, 4  ;;  %s200_s26 = int_to_ptr.vmem [resolvable:$true] %s199_s26 }
   0x8   :  { %v289_v14 = vpack.c.bf16 %v26_v13, %v25_v12  ;;  %v28_v16 = vld [vmem:[%s460_s1 + $0x48] sm:$0xff]  ;;  %v29_v18 = vld [vmem:[%s460_s1 + $0x50] sm:$0xff]  ;;  %v30_v19 = vld [vmem:[%s460_s1 + $0x58] sm:$0xff]  ;;  %v181_v48 = vshrl.u32 %v180_v47, 7  ;;  %s314_s27 = scalar_lea.vmem %s200_s26, 128  ;;  %p319_p1 = scmp.lt.s32.totalorder %s200_s26, %s200_s26 }
   0x9   :  { %v293_v17 = vpack.c.bf16 %v28_v16, %v27_v15  ;;  %v297_v20 = vpack.c.bf16 %v30_v19, %v29_v18  ;;  %v31_v21 = vld [vmem:[%s460_s1 + $0x60] sm:$0xff]  ;;  %v32_v22 = vld [vmem:[%s460_s1 + $0x68] sm:$0xff]  ;;  %v33_v24 = vld [vmem:[%s460_s1 + $0x70] sm:$0xff]  ;;  %p315_p0 = scmp.ne.s32.totalorder %s200_s26, %s314_s27  ;;  %p320_p2 = scmp.lt.s32.totalorder %s314_s27, %s314_s27 }
   0xa   :  { %v301_v23 = vpack.c.bf16 %v32_v22, %v31_v21  ;;  %v34_v25 = vld [vmem:[%s460_s1 + $0x78] sm:$0xff]  ;;  %v18_v27 = vld [vmem:[%s459_s0] sm:$0xff]  ;;  %v182_v50 = vsub.s32 0, %v181_v48 }
   0xb   :  { %v305_v26 = vpack.c.bf16 %v34_v25, %v33_v24  ;;  %v175_v49 = vld [vmem:[%s461_s2] sm:$0x1]  ;;  %p321_p3 = por %p320_p2, %p319_p1 }
   0xc   :  { %283 = vmatpush3.bf16.xpose.msk.msra.mxu0 %vm375_vm1, %v281_v8  ;;  %v177_v53 = vld [vmem:[%s462_s3] sm:$0x1] }
   0xd   :  { %284 = vmatprep.subr.bf16.mxu0 %v338_v2  ;;  %p322_p4 = pnand %p321_p3, %p315_p0 }
  0x14   :  { %287 = vmatpush3.bf16.xpose.msk.msra.mxu0 %vm375_vm1, %v285_v11 }
  0x15   :  { %288 = vmatprep.subr.bf16.mxu0 %v338_v2 }
  0x1c   :  { %291 = vmatpush3.bf16.xpose.msk.msra.mxu0 %vm375_vm1, %v289_v14 }
  0x1d   :  { %292 = vmatprep.subr.bf16.mxu0 %v338_v2 }
  0x24   :  { %295 = vmatpush3.bf16.xpose.msk.msra.mxu0 %vm375_vm1, %v293_v17 }
  0x25   :  { %296 = vmatprep.subr.bf16.mxu0 %v338_v2 }
  0x2c   :  { %299 = vmatpush3.bf16.xpose.msk.msra.mxu0 %vm375_vm1, %v297_v20 }
  0x2d   :  { %300 = vmatprep.subr.bf16.mxu0 %v338_v2 }
  0x34   :  { %303 = vmatpush3.bf16.xpose.msk.msra.mxu0 %vm375_vm1, %v301_v23 }
  0x35   :  { %304 = vmatprep.subr.bf16.mxu0 %v338_v2 }
  0x3c   :  { %307 = vmatpush3.bf16.xpose.msk.msra.mxu0 %vm375_vm1, %v305_v26 }
  0x43   :  { %274 = vmatmul.mubr.msk.f32.vlgmr.msra.gmra.mrb[0].mxu0 %vm35_vm0, %v18_v27 }
 0x116   :  { %v153_v28 = vpop.f32.mrb[0].mxu0 }
 0x117   :  { %v157_v29 = vrot.slane %v153_v28, 4  ;;  %v275_v30 = vpop.f32.mrb[1].mxu0 }
 0x119   :  { %v158_v31 = vadd.f32 %v157_v29, %v153_v28 }
 0x11b   :  { %v159_v32 = vrot.slane %v158_v31, 2 }
 0x11d   :  { %v160_v33 = vadd.f32 %v159_v32, %v158_v31 }
 0x11f   :  { %v161_v34 = vrot.slane %v160_v33, 1 }
 0x121   :  { %v162_v35 = vadd.f32 %v161_v34, %v160_v33 }
 0x123   :  { %v163_v36 = vmul.f32 0.125, %v162_v35 }
 0x125   :  { %v164_v37 = vsub.f32 %v153_v28, %v163_v36 }
 0x127   :  { %v165_v38 = vmul.f32 %v164_v37, %v164_v37 }
 0x129   :  { %v166_v39 = vrot.slane %v165_v38, 4 }
 0x12b   :  { %v167_v40 = vadd.f32 %v166_v39, %v165_v38 }
 0x12d   :  { %v168_v41 = vrot.slane %v167_v40, 2 }
 0x12f   :  { %v169_v42 = vadd.f32 %v168_v41, %v167_v40 }
 0x131   :  { %v170_v43 = vrot.slane %v169_v42, 1 }
 0x133   :  { %v171_v44 = vadd.f32 %v170_v43, %v169_v42 }
 0x135   :  { %v172_v45 = vmul.f32 0.125, %v171_v44 }
 0x137   :  { %v173_v46 = vadd.f32 1e-05, %v172_v45 }
 0x139   :  { %312 = vrsqrt.f32 %v173_v46 }
 0x143   :  { %v313_v51 = vpop.eup %312 }
 0x144   :  { %v176_v52 = vmul.f32 %v313_v51, %v175_v49 }
 0x146   :  { %v178_v54 = vmul.f32 %v176_v52, %v163_v36  ;;  %v183_v55 = vrot.slane %v176_v52, %v182_v50 }
 0x148   :  { %v179_v56 = vsub.f32 %v177_v53, %v178_v54  ;;  %v184_v57 = vmul.f32 %v183_v55, %v153_v28 }
 0x14a   :  { %v189_v58 = vrot.slane %v179_v56, %v182_v50 }
 0x14c   :  { %v191_v59 = vadd.f32 %v189_v58, %v184_v57 }
 0x14e   :  { %192 = vst [vmem:[#allocation2] sm:$0xff] %v191_v59 }
 0x14f   :  { %325 = shalt.err (!%p322_p4)
}
 0x150   :  { %s326_s3 = scalar_lea.hbm %s463_s4, 128 }
 0x151   :  { %p327_p5 = scmp.ne.s32.totalorder %s463_s4, %s326_s3  ;;  %p330_p6 = scmp.lt.u32.totalorder %s326_s3, %s463_s4 }
 0x153   :  { %p332_p7 = pnand %p330_p6, %p327_p5 }
 0x155   :  { %335 = shalt.err (!%p332_p7)
}
 0x156   :  { %202 = dma.vmem_to_hbm [thread:$0]  %s200_s26, 128, %s463_s4, [#allocation3]  }
 0x157   :  { %336 = dma.done.wait [#allocation3], 128  }
 0x158   :  { %337 = vsyncadd [#allocation3], 4294967168 }
 0x159   :  { %206 = vsyncpa [#allocation3], 1 }

</bundles_post_ra>
